<compile_context>
chip_gen: v7x
topology: tpu7x:2x2x1
jax: 0.10.0
libtpu: 0.0.40
codegen_flags: <defaults>
</compile_context>

<pallas_src>
import functools

import jax
import jax.numpy as jnp
from jax import lax
from jax.experimental import pallas as pl
from jax.experimental.pallas import tpu as pltpu

IGNORE_INDEX = -100


def _round_up(x: int, m: int) -> int:
    return (x + m - 1) // m * m


def _choose_tile_n(n_tok: int) -> int:
    """Pick the token-tile size minimizing padded output rows while keeping tiles large."""
    n8 = _round_up(max(n_tok, 1), 8)
    if n8 <= 1024:
        # Single tile sized to the sublane-aligned token count: zero padded rows.
        return n8
    if n8 <= 4096:
        # Two near-equal tiles: <=8 padded rows, and the parallel grid axis can
        # still shard across v7x's 2 TensorCores.
        return _round_up((n8 + 1) // 2, 8)
    # Long sequences: large fixed tiles, minimizing padded (wasted-write) rows.
    best_t, best_pad = 2048, None
    for t in (2048, 1024, 512, 256):
        pad = _round_up(n8, t) - n8
        if best_pad is None or pad < best_pad:
            best_t, best_pad = t, pad
    return best_t


def unigram_kernel(idx_ref, prob_ref, out_ref, *, ignore_index, n_valid_rows):
    """One token tile per grid step.

    idx_ref  : VMEM (TILE_N, 1)     int32  word ids for this tile
    prob_ref : VMEM (V_pad, P_pad)  f32    row-normalized pronunciation probs (resident)
    out_ref  : VMEM (TILE_N, P_pad) f32    gathered probability rows
    """
    v_pad = prob_ref.shape[0]
    tile_n = out_ref.shape[0]

    idx = idx_ref[...]                                   # (TILE_N, 1) int32
    # forward(): map ignore_index -> 0 before the lookup
    idx = jnp.where(idx == ignore_index, 0, idx)
    # Guard stray / padded ids inside the real (unpadded) rows — keeps the one-hot
    # well-formed with no OOB table reads. (Invalid ids clamp instead of erroring.)
    idx = jnp.clip(idx, 0, n_valid_rows - 1)

    # Block gather via one-hot MXU matmul: (TILE_N, V_pad) @ (V_pad, P_pad).
    iota = lax.broadcasted_iota(jnp.int32, (tile_n, v_pad), 1)
    onehot = (iota == idx).astype(prob_ref.dtype)
    out_ref[...] = jnp.dot(
        onehot, prob_ref[...], preferred_element_type=jnp.float32
    ).astype(out_ref.dtype)


def unigram_pronunciator_forward(x, pron_counts, ignore_index=IGNORE_INDEX):
    """JAX/Pallas equivalent of UnigramPronunciator.forward."""
    orig_shape = x.shape
    v, p = pron_counts.shape

    # pronounce_prob(): one-time exact row normalization in the wrapper (O(V*P)).
    counts = pron_counts.astype(jnp.float32)
    norm = counts.sum(axis=1, keepdims=True)
    norm = jnp.where(norm > 0.0, norm, 1.0)
    prob = counts / norm

    # Lane-dense / sublane-aligned table: pad P to a multiple of 128, V to a multiple of 8.
    p_pad = _round_up(p, 128)
    v_pad = _round_up(v, 8)
    prob = jnp.pad(prob, ((0, v_pad - v), (0, p_pad - p)))

    idx = x.reshape(-1).astype(jnp.int32)
    n_tok = idx.shape[0]

    tile_n = _choose_tile_n(n_tok)
    n_pad = _round_up(max(n_tok, 1), tile_n)
    idx = jnp.pad(idx, (0, n_pad - n_tok)).reshape(n_pad, 1)

    grid = (n_pad // tile_n,)

    cost = pl.CostEstimate(
        flops=2 * n_pad * v_pad * p_pad,
        transcendentals=0,
        bytes_accessed=n_pad * 4 + v_pad * p_pad * 4 + n_pad * p_pad * 4,
    )

    out = pl.pallas_call(
        functools.partial(
            unigram_kernel, ignore_index=ignore_index, n_valid_rows=v
        ),
        out_shape=jax.ShapeDtypeStruct((n_pad, p_pad), jnp.float32),
        grid_spec=pltpu.PrefetchScalarGridSpec(
            num_scalar_prefetch=0,
            grid=grid,
            in_specs=[
                # per-tile word ids
                pl.BlockSpec((tile_n, 1), lambda i: (i, 0)),
                # normalized table: block index never changes -> single buffer
                pl.BlockSpec(
                    (v_pad, p_pad),
                    lambda i: (0, 0),
                    pipeline_mode=pl.Buffered(1),
                ),
            ],
            out_specs=pl.BlockSpec((tile_n, p_pad), lambda i: (i, 0)),
        ),
        compiler_params=pltpu.CompilerParams(
            dimension_semantics=("parallel",),
        ),
        cost_estimate=cost,
    )(idx, prob)

    return out[:n_tok, :p].reshape(*orig_shape, p)


def _reference_forward(x, pron_counts, ignore_index=IGNORE_INDEX):
    norm = pron_counts.sum(axis=1, keepdims=True)
    norm = jnp.where(norm > 0, norm, 1.0)
    prob = pron_counts / norm
    x_safe = jnp.where(x != ignore_index, x, 0)
    return prob[x_safe]


if __name__ == "__main__":
    key = jax.random.PRNGKey(0)
    k_counts, k_x = jax.random.split(key)

    V = 16          # vocab size (n_word_class)
    P = 40          # phone set size (n_phone_class) — deliberately NOT lane-aligned
    B, T = 2, 8     # batch of word-id sequences

    # Deterministic synthetic pron_counts; include a zero row to exercise the
    # norm > 0 guard.
    pron_counts = jnp.floor(
        jax.random.uniform(k_counts, (V, P), dtype=jnp.float32) * 5.0
    )
    pron_counts = pron_counts.at[3, :].set(0.0)

    # Word ids with a couple of ignore_index entries.
    x = jax.random.randint(k_x, (B, T), 0, V, dtype=jnp.int32)
    x = x.at[0, 2].set(IGNORE_INDEX)
    x = x.at[1, 5].set(IGNORE_INDEX)

    out = unigram_pronunciator_forward(x, pron_counts)
    out = jax.block_until_ready(out)

    ref = _reference_forward(x, pron_counts)
    assert out.shape == (B, T, P), out.shape
    # Exact normalization hoisted to the wrapper -> only MXU one-hot-gather rounding left.
    assert jnp.allclose(out, ref, rtol=1e-5, atol=1e-6), "mismatch vs reference"

    print("KERNEL_OK")
</pallas_src>

<mosaic_0001>
module attributes {stable_mosaic.version = 11 : i64} {
  func.func @unigram_kernel(%arg0: i32, %arg1: memref<16x1xi32, #tpu.memory_space<vmem>>, %arg2: memref<16x128xf32, #tpu.memory_space<vmem>>, %arg3: memref<16x128xf32, #tpu.memory_space<vmem>>) attributes {dimension_semantics = [#tpu.dimension_semantics<parallel>], iteration_bounds = array<i64: 1>, scalar_prefetch = 0 : i64, scratch_operands = 0 : i64, tpu.core_type = #tpu.core_type<tc>, window_params = [{transform_indices = @transform_0, window_bounds = array<i64: 16, 1>}, {pipeline_mode = #tpu.pipeline_mode<synchronous>, transform_indices = @transform_1, window_bounds = array<i64: 16, 128>}, {transform_indices = @transform_2, window_bounds = array<i64: 16, 128>}]} {
    %c0 = arith.constant 0 : index
    %c0_0 = arith.constant 0 : index
    %0 = vector.load %arg1[%c0, %c0_0] : memref<16x1xi32, #tpu.memory_space<vmem>>, vector<16x1xi32>
    %c-100_i32 = arith.constant -100 : i32
    %1 = vector.broadcast %c-100_i32 : i32 to vector<16x1xi32>
    %2 = arith.cmpi eq, %0, %1 : vector<16x1xi32>
    %c0_i32 = arith.constant 0 : i32
    %3 = vector.broadcast %c0_i32 : i32 to vector<16x1xi32>
    %4 = arith.select %2, %3, %0 : vector<16x1xi1>, vector<16x1xi32>
    %c0_i32_1 = arith.constant 0 : i32
    %c15_i32 = arith.constant 15 : i32
    %5 = vector.broadcast %c0_i32_1 : i32 to vector<16x1xi32>
    %6 = arith.maxsi %5, %4 : vector<16x1xi32>
    %7 = vector.broadcast %c15_i32 : i32 to vector<16x1xi32>
    %8 = arith.minsi %7, %6 : vector<16x1xi32>
    %9 = tpu.iota {dimensions = array<i32: 1>} : vector<16x16xi32>
    %10 = vector.broadcast %8 : vector<16x1xi32> to vector<16x16xi32>
    %11 = arith.cmpi eq, %9, %10 : vector<16x16xi32>
    %12 = arith.extui %11 : vector<16x16xi1> to vector<16x16xi32>
    %13 = arith.sitofp %12 : vector<16x16xi32> to vector<16x16xf32>
    %c0_2 = arith.constant 0 : index
    %c0_3 = arith.constant 0 : index
    %14 = vector.load %arg2[%c0_2, %c0_3] : memref<16x128xf32, #tpu.memory_space<vmem>>, vector<16x128xf32>
    %cst = arith.constant dense<0.000000e+00> : vector<16x128xf32>
    %15 = tpu.matmul %13, %14, %cst {dimension_numbers = #tpu.dot_dimension_numbers<[1], [0], [0], [1], [0, 0, 1, 1], [], []>} : vector<16x16xf32>, vector<16x128xf32>, vector<16x128xf32> -> vector<16x128xf32>
    %c0_4 = arith.constant 0 : index
    %c0_5 = arith.constant 0 : index
    %16 = vector.load %arg3[%c0_4, %c0_5] : memref<16x128xf32, #tpu.memory_space<vmem>>, vector<16x128xf32>
    tpu.vector_store %arg3[%c0_4, %c0_5], %15 {strides = array<i32>} : memref<16x128xf32, #tpu.memory_space<vmem>>, vector<16x128xf32>,
    return
  }
  func.func @transform_0(%arg0: i32) -> (i32, i32) {
    %c0_i32 = arith.constant 0 : i32
    %c0_i32_0 = arith.constant 0 : i32
    return %arg0, %c0_i32 : i32, i32
  }
  func.func @transform_1(%arg0: i32) -> (i32, i32) {
    %c0_i32 = arith.constant 0 : i32
    %c0_i32_0 = arith.constant 0 : i32
    %c0_i32_1 = arith.constant 0 : i32
    return %c0_i32, %c0_i32_0 : i32, i32
  }
  func.func @transform_2(%arg0: i32) -> (i32, i32) {
    %c0_i32 = arith.constant 0 : i32
    %c0_i32_0 = arith.constant 0 : i32
    return %arg0, %c0_i32 : i32, i32
  }
}

</mosaic_0001>

<bundles_post_ra>
// kernel: tpu_custom_call.1
= control target key start
LH: loop header
LB: loop body
LE: loop exit
PB: predicated region body
PF: predicated region fallthrough
CT: control target
= control target key end

     0   :  { %s235_s0 = inlined_call_operand.vmem [shape: s32[16,1], index: 0, kind: input, shape index: {}]   ;;  %s236_s1 = inlined_call_operand.vmem [shape: f32[16,128], index: 1, kind: input, shape index: {}]   ;;  %s237_s2 = inlined_call_operand.hbm [shape: f32[16,128], index: 2, kind: output, shape index: {}]  }
   0x1   :  { %v12_v0 = vld [vmem:[%s235_s0] sm:$0xff]  ;;  %v13_v1 = vld [vmem:[%s235_s0 + $0x8] sm:$0xff] }
   0x2   :  { %7 = vsyncpa [#allocation3], 0  ;;  %v191_v2 = vmov 0   ;;  %vm14_vm0 = vcmp.eq.s32.totalorder %v12_v0, 4294967196  ;;  %vm15_vm1 = vcmp.eq.s32.totalorder %v13_v1, 4294967196  ;;  %v40_v8 = vld [vmem:[%s236_s1] sm:$0xff]  ;;  %v26_v12 = vlaneseq }
   0x3   :  { %166 = vset.pattern.permute.xlu0 %v191_v2  ;;  %v16_v3 = vsel %vm14_vm0, 0, %v12_v0  ;;  %v17_v4 = vsel %vm15_vm1, 0, %v13_v1  ;;  %v41_v9 = vld [vmem:[%s236_s1 + $0x8] sm:$0xff]  ;;  %vm42_vm6 = vcmask 130048   ;;  %v192_v15 = vmov 0.0   ;;  %s193_s16 = smov [#allocation2]  }
   0x4   :  { %vm18_vm2 = vcmp.gt.s32.totalorder %v16_v3, 0  ;;  %vm20_vm3 = vcmp.gt.s32.totalorder %v17_v4, 0  ;;  %v157_v10 = vpack.c.bf16 %v41_v9, %v40_v8  ;;  %v27_v13 = vand.u32 127, %v26_v12  ;;  %s131_s1 = sshll.u32 %s193_s16, 4  ;;  %s132_s1 = int_to_ptr.vmem [resolvable:$true] %s131_s1 }
   0x5   :  { %v19_v5 = vsel %vm18_vm2, %v16_v3, 0  ;;  %v21_v6 = vsel %vm20_vm3, %v17_v4, 0  ;;  %s167_s17 = scalar_lea.vmem %s132_s1, 256  ;;  %p172_p1 = scmp.lt.s32.totalorder %s132_s1, %s132_s1 }
   0x6   :  { %vm22_vm4 = vcmp.lt.s32.totalorder %v19_v5, 15  ;;  %vm24_vm5 = vcmp.lt.s32.totalorder %v21_v6, 15  ;;  %158 = vmatprep.subr.bf16.mxu0 %v157_v10  ;;  %p168_p0 = scmp.ne.s32.totalorder %s132_s1, %s167_s17  ;;  %p173_p2 = scmp.lt.s32.totalorder %s167_s17, %s167_s17 }
   0x7   :  { %v23_v7 = vsel %vm22_vm4, %v19_v5, 15  ;;  %v25_v11 = vsel %vm24_vm5, %v21_v6, 15  ;;  %160 = vmatpush3.bf16.msra.mxu0 %v157_v10 }
   0x8   :  { %29 = vperm.xlu0 %166, %v23_v7   ;;  %p174_p3 = por %p173_p2, %p172_p1 }
   0xa   :  { %p175_p4 = pnand %p174_p3, %p168_p0 }
   0xc   :  { %32 = vperm.xlu0 %166, %v25_v11  }
  0x87   :  { %v30_v14 = vpop.permute.xlu0 %29 }
  0x88   :  { %vm34_vm7 = vcmp.eq.s32.totalorder %v27_v13, %v30_v14 }
  0x89   :  { %v142_v16 = vsel %vm34_vm7, 1.0, %v192_v15 }
  0x8a   :  { %154 = vmatprep.mubr.msk.f32.mxu0 %vm42_vm6, %v142_v16 }
  0x8b   :  { %v33_v17 = vpop.permute.xlu0 %32 }
  0x8c   :  { %vm35_vm8 = vcmp.eq.s32.totalorder %v27_v13, %v33_v17 }
  0x8d   :  { %v143_v18 = vsel %vm35_vm8, 1.0, %v192_v15 }
  0x8e   :  { %155 = vmatmul.mubr.msk.f32.vlgmr.msra.gmra.mrb[0].mxu0 %vm42_vm6, %v143_v18 }
 0x161   :  { %v156_v19 = vpop.f32.mrb[0].mxu0 }
 0x162   :  { %125 = vst [vmem:[#allocation2 + $0x8] sm:$0xff] %v156_v19  ;;  %v115_v20 = vpop.f32.mrb[1].mxu0 }
 0x163   :  { %124 = vst [vmem:[#allocation2] sm:$0xff] %v115_v20 }
 0x164   :  { %178 = shalt.err (!%p175_p4)
}
 0x165   :  { %s179_s20 = scalar_lea.hbm %s237_s2, 256 }
 0x166   :  { %p180_p5 = scmp.ne.s32.totalorder %s237_s2, %s179_s20  ;;  %p183_p6 = scmp.lt.u32.totalorder %s179_s20, %s237_s2 }
 0x168   :  { %p185_p7 = pnand %p183_p6, %p180_p5 }
 0x16a   :  { %188 = shalt.err (!%p185_p7)
}
 0x16b   :  { %s194_s25 = smov 128   ;;  %s195_s26 = smov 8  }
 0x16c   :  { %137 = dma.vmem_to_hbm [thread:$0]  %s132_s1, 256, %s237_s2, [#allocation3], %s194_s25, %s194_s25, %s195_s26  }
 0x16d   :  { %189 = dma.done.wait [#allocation3], 256  }
 0x16e   :  { %190 = vsyncadd [#allocation3], 4294967040 }
 0x16f   :  { %141 = vsyncpa [#allocation3], 1 }

</bundles_post_ra>
